<compile_context>
chip_gen: v6e
topology: v6e:2x2x1
jax: 0.10.0
libtpu: 0.0.40
codegen_flags: <defaults>
</compile_context>

<pallas_src>
import math
import functools

import jax
import jax.numpy as jnp
from jax import lax
from jax.experimental import pallas as pl
from jax.experimental.pallas import tpu as pltpu


def _mha_kernel(q_ref, k_ref, v_ref,
                wq_ref, bq_ref, wk_ref, bk_ref, wv_ref, bv_ref, wo_ref,
                o_ref, *, h, d_k, compute_dtype, approx_recip):
    """One (batch, q-tile) grid step; all heads are handled inside the block."""
    q = q_ref[0].astype(compute_dtype)            # (tq, D)
    k = k_ref[0].astype(compute_dtype)            # (S,  D)
    v = v_ref[0].astype(compute_dtype)            # (S,  D)

    # Fused, full-width projections: one D-deep matmul per tensor (not per
    # head).  Scale 1/sqrt(d_k) is already folded into Wq / bq on the host.
    qh = jnp.dot(q, wq_ref[...], preferred_element_type=jnp.float32) + bq_ref[...]
    kh = jnp.dot(k, wk_ref[...], preferred_element_type=jnp.float32) + bk_ref[...]
    vh = jnp.dot(v, wv_ref[...], preferred_element_type=jnp.float32) + bv_ref[...]

    # Per-head scaled-dot-product attention on static lane slices of the fused
    # projections.  h is small and static, so this unrolls at trace time.
    ctx_parts = []
    for i in range(h):
        sl = slice(i * d_k, (i + 1) * d_k)
        qi = qh[:, sl].astype(compute_dtype)      # (tq, d_k)
        ki = kh[:, sl].astype(compute_dtype)      # (S,  d_k)
        vi = vh[:, sl].astype(compute_dtype)      # (S,  d_k)

        # Contract the last dims directly -- no materialized ki.T.
        s = lax.dot_general(qi, ki, (((1,), (1,)), ((), ())),
                            preferred_element_type=jnp.float32)       # (tq, S)
        s = s - jnp.max(s, axis=-1, keepdims=True)
        p = jnp.exp(s)                                                # f32 softmax math
        p = p * pl.reciprocal(jnp.sum(p, axis=-1, keepdims=True),
                              approx=approx_recip)

        ctx_parts.append(
            jnp.dot(p.astype(compute_dtype), vi,
                    preferred_element_type=jnp.float32))              # (tq, d_k)

    ctx = jnp.concatenate(ctx_parts, axis=-1)                         # (tq, D)

    # Single D-deep output projection with the full (bias-free) Wo.
    out = jnp.dot(ctx.astype(compute_dtype), wo_ref[...],
                  preferred_element_type=jnp.float32)                 # (tq, D)
    o_ref[0] = out.astype(o_ref.dtype)


def multi_head_attention(q, k, v, params, *, h, compute_dtype=jnp.float32):
    B, S, D = q.shape
    d_k = D // h
    scale = 1.0 / math.sqrt(d_k)

    # q-tile axis keeps the (tq, S) score block bounded for longer sequences
    # and gives v7x a second parallel axis to shard across its 2 TensorCores.
    tq = S if S <= 512 else 512
    assert S % tq == 0 and (tq == S or tq % 8 == 0)

    # PyTorch nn.Linear weights are (out, in); the MXU wants (in, out).
    # Fold the attention scale into the Q projection (exact for pow-2 scales).
    wq_t = (params["wq"].T * scale).astype(compute_dtype)             # (D, D)
    wk_t = params["wk"].T.astype(compute_dtype)
    wv_t = params["wv"].T.astype(compute_dtype)
    wo_t = params["wo"].T.astype(compute_dtype)
    bq = (params["bq"] * scale).reshape(1, D).astype(jnp.float32)
    bk = params["bk"].reshape(1, D).astype(jnp.float32)
    bv = params["bv"].reshape(1, D).astype(jnp.float32)

    kernel = functools.partial(
        _mha_kernel, h=h, d_k=d_k, compute_dtype=compute_dtype,
        approx_recip=bool(jnp.dtype(compute_dtype) == jnp.bfloat16))

    q_spec = pl.BlockSpec((1, tq, D), lambda b, qi: (b, qi, 0))
    kv_spec = pl.BlockSpec((1, S, D), lambda b, qi: (b, 0, 0))
    # Constant index maps -> weights stay VMEM-resident across the whole grid.
    w_spec = pl.BlockSpec((D, D), lambda b, qi: (0, 0))
    b_spec = pl.BlockSpec((1, D), lambda b, qi: (0, 0))
    # NOTE: D=32 in this demo -> masked stores; production d_model should be a
    # multiple of 128 for lane-dense vst.

    # Explicit VMEM budget (v7x: 64 MiB physical, 32 MiB default scoped).
    cw = jnp.dtype(compute_dtype).itemsize
    est = 2 * (tq * D + 2 * S * D) * q.dtype.itemsize        # double-buffered q/k/v
    est += 2 * (4 * D * D * cw + 3 * D * 4)                  # resident weight/bias slabs
    est += 2 * tq * D * q.dtype.itemsize                     # double-buffered output
    est += (2 * (tq + 2 * S) * D + 3 * tq * S) * 4           # f32 intermediates (rough)
    vmem_limit = int(min(64 * 2**20, max(32 * 2**20, 2 * est)))

    return pl.pallas_call(
        kernel,
        out_shape=jax.ShapeDtypeStruct((B, S, D), q.dtype),
        grid_spec=pltpu.PrefetchScalarGridSpec(
            num_scalar_prefetch=0,
            grid=(B, S // tq),
            in_specs=[
                q_spec, kv_spec, kv_spec,                    # q, k, v
                w_spec, b_spec,                              # Wq (pre-scaled), bq
                w_spec, b_spec,                              # Wk, bk
                w_spec, b_spec,                              # Wv, bv
                w_spec,                                      # Wo
            ],
            out_specs=pl.BlockSpec((1, tq, D), lambda b, qi: (b, qi, 0)),
        ),
        compiler_params=pltpu.CompilerParams(
            dimension_semantics=("parallel", "parallel"),
            vmem_limit_bytes=vmem_limit),
    )(q, k, v, wq_t, bq, wk_t, bk, wv_t, bv, wo_t)


def reference_mha(q, k, v, params, *, h):
    """Pure-JAX reference matching the PyTorch forward (eval mode)."""
    B, S, D = q.shape
    d_k = D // h

    def lin(x, w, b):
        return x @ w.T + b

    def split_heads(x):
        return x.reshape(B, S, h, d_k).transpose(0, 2, 1, 3)     # (B, h, S, d_k)

    Q = split_heads(lin(q, params["wq"], params["bq"]))
    K = split_heads(lin(k, params["wk"], params["bk"]))
    V = split_heads(lin(v, params["wv"], params["bv"]))

    scores = jnp.einsum("bhqd,bhkd->bhqk", Q, K) / math.sqrt(d_k)
    p = jax.nn.softmax(scores, axis=-1)
    x = jnp.einsum("bhqk,bhkd->bhqd", p, V)
    x = x.transpose(0, 2, 1, 3).reshape(B, S, D)
    return x @ params["wo"].T


if __name__ == "__main__":
    # Module hyperparameters (defaults from __init__): h=8, d_model=32.
    h, d_model = 8, 32
    B, S = 2, 8

    key = jax.random.PRNGKey(0)
    ks = jax.random.split(key, 10)

    # Deterministic synthetic parameters (PyTorch (out, in) convention).
    params = {
        "wq": jax.random.normal(ks[0], (d_model, d_model), jnp.float32) * 0.05,
        "bq": jax.random.normal(ks[1], (d_model,), jnp.float32) * 0.05,
        "wk": jax.random.normal(ks[2], (d_model, d_model), jnp.float32) * 0.05,
        "bk": jax.random.normal(ks[3], (d_model,), jnp.float32) * 0.05,
        "wv": jax.random.normal(ks[4], (d_model, d_model), jnp.float32) * 0.05,
        "bv": jax.random.normal(ks[5], (d_model,), jnp.float32) * 0.05,
        "wo": jax.random.normal(ks[6], (d_model, d_model), jnp.float32) * 0.05,
    }

    q = jax.random.normal(ks[7], (B, S, d_model), jnp.float32)
    k = jax.random.normal(ks[8], (B, S, d_model), jnp.float32)
    v = jax.random.normal(ks[9], (B, S, d_model), jnp.float32)

    ref = reference_mha(q, k, v, params, h=h)

    # Full-precision path (exact reciprocal).
    out = jax.block_until_ready(multi_head_attention(q, k, v, params, h=h))
    assert out.shape == (B, S, d_model)
    assert jnp.allclose(out, ref, atol=1e-4, rtol=1e-4), "f32 mismatch vs reference"

    # bf16 MXU path (f32 accumulation / softmax, approx EUP reciprocal).
    out_bf16 = jax.block_until_ready(
        multi_head_attention(q, k, v, params, h=h, compute_dtype=jnp.bfloat16))
    assert jnp.allclose(out_bf16, ref, atol=1e-2, rtol=1e-2), "bf16 mismatch vs reference"

    print("KERNEL_OK")
</pallas_src>

<mosaic_0001>
module attributes {stable_mosaic.version = 11 : i64} {
  func.func @_mha_kernel(%arg0: i32, %arg1: i32, %arg2: memref<1x8x32xf32, #tpu.memory_space<vmem>>, %arg3: memref<1x8x32xf32, #tpu.memory_space<vmem>>, %arg4: memref<1x8x32xf32, #tpu.memory_space<vmem>>, %arg5: memref<32x32xf32, #tpu.memory_space<vmem>>, %arg6: memref<1x32xf32, #tpu.memory_space<vmem>>, %arg7: memref<32x32xf32, #tpu.memory_space<vmem>>, %arg8: memref<1x32xf32, #tpu.memory_space<vmem>>, %arg9: memref<32x32xf32, #tpu.memory_space<vmem>>, %arg10: memref<1x32xf32, #tpu.memory_space<vmem>>, %arg11: memref<32x32xf32, #tpu.memory_space<vmem>>, %arg12: memref<1x8x32xf32, #tpu.memory_space<vmem>>) attributes {dimension_semantics = [#tpu.dimension_semantics<parallel>, #tpu.dimension_semantics<parallel>], iteration_bounds = array<i64: 2, 1>, scalar_prefetch = 0 : i64, scratch_operands = 0 : i64, tpu.core_type = #tpu.core_type<tc>, window_params = [{transform_indices = @transform_0, window_bounds = array<i64: 1, 8, 32>}, {transform_indices = @transform_1, window_bounds = array<i64: 1, 8, 32>}, {transform_indices = @transform_2, window_bounds = array<i64: 1, 8, 32>}, {pipeline_mode = #tpu.pipeline_mode<synchronous>, transform_indices = @transform_3, window_bounds = array<i64: 32, 32>}, {pipeline_mode = #tpu.pipeline_mode<synchronous>, transform_indices = @transform_4, window_bounds = array<i64: 1, 32>}, {pipeline_mode = #tpu.pipeline_mode<synchronous>, transform_indices = @transform_5, window_bounds = array<i64: 32, 32>}, {pipeline_mode = #tpu.pipeline_mode<synchronous>, transform_indices = @transform_6, window_bounds = array<i64: 1, 32>}, {pipeline_mode = #tpu.pipeline_mode<synchronous>, transform_indices = @transform_7, window_bounds = array<i64: 32, 32>}, {pipeline_mode = #tpu.pipeline_mode<synchronous>, transform_indices = @transform_8, window_bounds = array<i64: 1, 32>}, {pipeline_mode = #tpu.pipeline_mode<synchronous>, transform_indices = @transform_9, window_bounds = array<i64: 32, 32>}, {transform_indices = @transform_10, window_bounds = array<i64: 1, 8, 32>}]} {
    %c0 = arith.constant 0 : index
    %c0_0 = arith.constant 0 : index
    %c0_1 = arith.constant 0 : index
    %0 = vector.load %arg2[%c0, %c0_0, %c0_1] : memref<1x8x32xf32, #tpu.memory_space<vmem>>, vector<1x8x32xf32>
    %1 = vector.shape_cast %0 : vector<1x8x32xf32> to vector<8x32xf32>
    %c0_2 = arith.constant 0 : index
    %c0_3 = arith.constant 0 : index
    %c0_4 = arith.constant 0 : index
    %2 = vector.load %arg3[%c0_2, %c0_3, %c0_4] : memref<1x8x32xf32, #tpu.memory_space<vmem>>, vector<1x8x32xf32>
    %3 = vector.shape_cast %2 : vector<1x8x32xf32> to vector<8x32xf32>
    %c0_5 = arith.constant 0 : index
    %c0_6 = arith.constant 0 : index
    %c0_7 = arith.constant 0 : index
    %4 = vector.load %arg4[%c0_5, %c0_6, %c0_7] : memref<1x8x32xf32, #tpu.memory_space<vmem>>, vector<1x8x32xf32>
    %5 = vector.shape_cast %4 : vector<1x8x32xf32> to vector<8x32xf32>
    %c0_8 = arith.constant 0 : index
    %c0_9 = arith.constant 0 : index
    %6 = vector.load %arg5[%c0_8, %c0_9] : memref<32x32xf32, #tpu.memory_space<vmem>>, vector<32x32xf32>
    %cst = arith.constant dense<0.000000e+00> : vector<8x32xf32>
    %7 = tpu.matmul %1, %6, %cst {dimension_numbers = #tpu.dot_dimension_numbers<[1], [0], [0], [1], [0, 0, 1, 1], [], []>} : vector<8x32xf32>, vector<32x32xf32>, vector<8x32xf32> -> vector<8x32xf32>
    %c0_10 = arith.constant 0 : index
    %c0_11 = arith.constant 0 : index
    %8 = vector.load %arg6[%c0_10, %c0_11] : memref<1x32xf32, #tpu.memory_space<vmem>>, vector<1x32xf32>
    %9 = vector.broadcast %8 : vector<1x32xf32> to vector<8x32xf32>
    %10 = arith.addf %7, %9 : vector<8x32xf32>
    %c0_12 = arith.constant 0 : index
    %c0_13 = arith.constant 0 : index
    %11 = vector.load %arg7[%c0_12, %c0_13] : memref<32x32xf32, #tpu.memory_space<vmem>>, vector<32x32xf32>
    %cst_14 = arith.constant dense<0.000000e+00> : vector<8x32xf32>
    %12 = tpu.matmul %3, %11, %cst_14 {dimension_numbers = #tpu.dot_dimension_numbers<[1], [0], [0], [1], [0, 0, 1, 1], [], []>} : vector<8x32xf32>, vector<32x32xf32>, vector<8x32xf32> -> vector<8x32xf32>
    %c0_15 = arith.constant 0 : index
    %c0_16 = arith.constant 0 : index
    %13 = vector.load %arg8[%c0_15, %c0_16] : memref<1x32xf32, #tpu.memory_space<vmem>>, vector<1x32xf32>
    %14 = vector.broadcast %13 : vector<1x32xf32> to vector<8x32xf32>
    %15 = arith.addf %12, %14 : vector<8x32xf32>
    %c0_17 = arith.constant 0 : index
    %c0_18 = arith.constant 0 : index
    %16 = vector.load %arg9[%c0_17, %c0_18] : memref<32x32xf32, #tpu.memory_space<vmem>>, vector<32x32xf32>
    %cst_19 = arith.constant dense<0.000000e+00> : vector<8x32xf32>
    %17 = tpu.matmul %5, %16, %cst_19 {dimension_numbers = #tpu.dot_dimension_numbers<[1], [0], [0], [1], [0, 0, 1, 1], [], []>} : vector<8x32xf32>, vector<32x32xf32>, vector<8x32xf32> -> vector<8x32xf32>
    %c0_20 = arith.constant 0 : index
    %c0_21 = arith.constant 0 : index
    %18 = vector.load %arg10[%c0_20, %c0_21] : memref<1x32xf32, #tpu.memory_space<vmem>>, vector<1x32xf32>
    %19 = vector.broadcast %18 : vector<1x32xf32> to vector<8x32xf32>
    %20 = arith.addf %17, %19 : vector<8x32xf32>
    %21 = vector.extract_strided_slice %10 {offsets = [0, 0], sizes = [8, 4], strides = [1, 1]} : vector<8x32xf32> to vector<8x4xf32>
    %22 = vector.extract_strided_slice %15 {offsets = [0, 0], sizes = [8, 4], strides = [1, 1]} : vector<8x32xf32> to vector<8x4xf32>
    %23 = vector.extract_strided_slice %20 {offsets = [0, 0], sizes = [8, 4], strides = [1, 1]} : vector<8x32xf32> to vector<8x4xf32>
    %cst_22 = arith.constant dense<0.000000e+00> : vector<8x8xf32>
    %24 = tpu.matmul %21, %22, %cst_22 {dimension_numbers = #tpu.dot_dimension_numbers<[1], [1], [0], [0], [0, 0, 1, 0], [], []>} : vector<8x4xf32>, vector<8x4xf32>, vector<8x8xf32> -> vector<8x8xf32>
    %cst_23 = arith.constant dense<0xFF800000> : vector<8xf32>
    %25 = vector.multi_reduction <maximumf>, %24, %cst_23 [1] : vector<8x8xf32> to vector<8xf32>
    %26 = vector.shape_cast %25 : vector<8xf32> to vector<8x1xf32>
    %27 = vector.broadcast %26 : vector<8x1xf32> to vector<8x8xf32>
    %28 = arith.subf %24, %27 : vector<8x8xf32>
    %29 = math.exp %28 : vector<8x8xf32>
    %cst_24 = arith.constant dense<0.000000e+00> : vector<8xf32>
    %30 = vector.multi_reduction <add>, %29, %cst_24 [1] : vector<8x8xf32> to vector<8xf32>
    %31 = vector.shape_cast %30 : vector<8xf32> to vector<8x1xf32>
    %32 = tpu.reciprocal %31 : vector<8x1xf32> -> vector<8x1xf32>
    %33 = vector.broadcast %32 : vector<8x1xf32> to vector<8x8xf32>
    %34 = arith.mulf %29, %33 : vector<8x8xf32>
    %cst_25 = arith.constant dense<0.000000e+00> : vector<8x4xf32>
    %35 = tpu.matmul %34, %23, %cst_25 {dimension_numbers = #tpu.dot_dimension_numbers<[1], [0], [0], [1], [0, 0, 1, 1], [], []>} : vector<8x8xf32>, vector<8x4xf32>, vector<8x4xf32> -> vector<8x4xf32>
    %36 = vector.extract_strided_slice %10 {offsets = [0, 4], sizes = [8, 4], strides = [1, 1]} : vector<8x32xf32> to vector<8x4xf32>
    %37 = vector.extract_strided_slice %15 {offsets = [0, 4], sizes = [8, 4], strides = [1, 1]} : vector<8x32xf32> to vector<8x4xf32>
    %38 = vector.extract_strided_slice %20 {offsets = [0, 4], sizes = [8, 4], strides = [1, 1]} : vector<8x32xf32> to vector<8x4xf32>
    %cst_26 = arith.constant dense<0.000000e+00> : vector<8x8xf32>
    %39 = tpu.matmul %36, %37, %cst_26 {dimension_numbers = #tpu.dot_dimension_numbers<[1], [1], [0], [0], [0, 0, 1, 0], [], []>} : vector<8x4xf32>, vector<8x4xf32>, vector<8x8xf32> -> vector<8x8xf32>
    %cst_27 = arith.constant dense<0xFF800000> : vector<8xf32>
    %40 = vector.multi_reduction <maximumf>, %39, %cst_27 [1] : vector<8x8xf32> to vector<8xf32>
    %41 = vector.shape_cast %40 : vector<8xf32> to vector<8x1xf32>
    %42 = vector.broadcast %41 : vector<8x1xf32> to vector<8x8xf32>
    %43 = arith.subf %39, %42 : vector<8x8xf32>
    %44 = math.exp %43 : vector<8x8xf32>
    %cst_28 = arith.constant dense<0.000000e+00> : vector<8xf32>
    %45 = vector.multi_reduction <add>, %44, %cst_28 [1] : vector<8x8xf32> to vector<8xf32>
    %46 = vector.shape_cast %45 : vector<8xf32> to vector<8x1xf32>
    %47 = tpu.reciprocal %46 : vector<8x1xf32> -> vector<8x1xf32>
    %48 = vector.broadcast %47 : vector<8x1xf32> to vector<8x8xf32>
    %49 = arith.mulf %44, %48 : vector<8x8xf32>
    %cst_29 = arith.constant dense<0.000000e+00> : vector<8x4xf32>
    %50 = tpu.matmul %49, %38, %cst_29 {dimension_numbers = #tpu.dot_dimension_numbers<[1], [0], [0], [1], [0, 0, 1, 1], [], []>} : vector<8x8xf32>, vector<8x4xf32>, vector<8x4xf32> -> vector<8x4xf32>
    %51 = vector.extract_strided_slice %10 {offsets = [0, 8], sizes = [8, 4], strides = [1, 1]} : vector<8x32xf32> to vector<8x4xf32>
    %52 = vector.extract_strided_slice %15 {offsets = [0, 8], sizes = [8, 4], strides = [1, 1]} : vector<8x32xf32> to vector<8x4xf32>
    %53 = vector.extract_strided_slice %20 {offsets = [0, 8], sizes = [8, 4], strides = [1, 1]} : vector<8x32xf32> to vector<8x4xf32>
    %cst_30 = arith.constant dense<0.000000e+00> : vector<8x8xf32>
    %54 = tpu.matmul %51, %52, %cst_30 {dimension_numbers = #tpu.dot_dimension_numbers<[1], [1], [0], [0], [0, 0, 1, 0], [], []>} : vector<8x4xf32>, vector<8x4xf32>, vector<8x8xf32> -> vector<8x8xf32>
    %cst_31 = arith.constant dense<0xFF800000> : vector<8xf32>
    %55 = vector.multi_reduction <maximumf>, %54, %cst_31 [1] : vector<8x8xf32> to vector<8xf32>
    %56 = vector.shape_cast %55 : vector<8xf32> to vector<8x1xf32>
    %57 = vector.broadcast %56 : vector<8x1xf32> to vector<8x8xf32>
    %58 = arith.subf %54, %57 : vector<8x8xf32>
    %59 = math.exp %58 : vector<8x8xf32>
    %cst_32 = arith.constant dense<0.000000e+00> : vector<8xf32>
    %60 = vector.multi_reduction <add>, %59, %cst_32 [1] : vector<8x8xf32> to vector<8xf32>
    %61 = vector.shape_cast %60 : vector<8xf32> to vector<8x1xf32>
    %62 = tpu.reciprocal %61 : vector<8x1xf32> -> vector<8x1xf32>
    %63 = vector.broadcast %62 : vector<8x1xf32> to vector<8x8xf32>
    %64 = arith.mulf %59, %63 : vector<8x8xf32>
    %cst_33 = arith.constant dense<0.000000e+00> : vector<8x4xf32>
    %65 = tpu.matmul %64, %53, %cst_33 {dimension_numbers = #tpu.dot_dimension_numbers<[1], [0], [0], [1], [0, 0, 1, 1], [], []>} : vector<8x8xf32>, vector<8x4xf32>, vector<8x4xf32> -> vector<8x4xf32>
    %66 = vector.extract_strided_slice %10 {offsets = [0, 12], sizes = [8, 4], strides = [1, 1]} : vector<8x32xf32> to vector<8x4xf32>
    %67 = vector.extract_strided_slice %15 {offsets = [0, 12], sizes = [8, 4], strides = [1, 1]} : vector<8x32xf32> to vector<8x4xf32>
    %68 = vector.extract_strided_slice %20 {offsets = [0, 12], sizes = [8, 4], strides = [1, 1]} : vector<8x32xf32> to vector<8x4xf32>
    %cst_34 = arith.constant dense<0.000000e+00> : vector<8x8xf32>
    %69 = tpu.matmul %66, %67, %cst_34 {dimension_numbers = #tpu.dot_dimension_numbers<[1], [1], [0], [0], [0, 0, 1, 0], [], []>} : vector<8x4xf32>, vector<8x4xf32>, vector<8x8xf32> -> vector<8x8xf32>
    %cst_35 = arith.constant dense<0xFF800000> : vector<8xf32>
    %70 = vector.multi_reduction <maximumf>, %69, %cst_35 [1] : vector<8x8xf32> to vector<8xf32>
    %71 = vector.shape_cast %70 : vector<8xf32> to vector<8x1xf32>
    %72 = vector.broadcast %71 : vector<8x1xf32> to vector<8x8xf32>
    %73 = arith.subf %69, %72 : vector<8x8xf32>
    %74 = math.exp %73 : vector<8x8xf32>
    %cst_36 = arith.constant dense<0.000000e+00> : vector<8xf32>
    %75 = vector.multi_reduction <add>, %74, %cst_36 [1] : vector<8x8xf32> to vector<8xf32>
    %76 = vector.shape_cast %75 : vector<8xf32> to vector<8x1xf32>
    %77 = tpu.reciprocal %76 : vector<8x1xf32> -> vector<8x1xf32>
    %78 = vector.broadcast %77 : vector<8x1xf32> to vector<8x8xf32>
    %79 = arith.mulf %74, %78 : vector<8x8xf32>
    %cst_37 = arith.constant dense<0.000000e+00> : vector<8x4xf32>
    %80 = tpu.matmul %79, %68, %cst_37 {dimension_numbers = #tpu.dot_dimension_numbers<[1], [0], [0], [1], [0, 0, 1, 1], [], []>} : vector<8x8xf32>, vector<8x4xf32>, vector<8x4xf32> -> vector<8x4xf32>
    %81 = vector.extract_strided_slice %10 {offsets = [0, 16], sizes = [8, 4], strides = [1, 1]} : vector<8x32xf32> to vector<8x4xf32>
    %82 = vector.extract_strided_slice %15 {offsets = [0, 16], sizes = [8, 4], strides = [1, 1]} : vector<8x32xf32> to vector<8x4xf32>
    %83 = vector.extract_strided_slice %20 {offsets = [0, 16], sizes = [8, 4], strides = [1, 1]} : vector<8x32xf32> to vector<8x4xf32>
    %cst_38 = arith.constant dense<0.000000e+00> : vector<8x8xf32>
    %84 = tpu.matmul %81, %82, %cst_38 {dimension_numbers = #tpu.dot_dimension_numbers<[1], [1], [0], [0], [0, 0, 1, 0], [], []>} : vector<8x4xf32>, vector<8x4xf32>, vector<8x8xf32> -> vector<8x8xf32>
    %cst_39 = arith.constant dense<0xFF800000> : vector<8xf32>
    %85 = vector.multi_reduction <maximumf>, %84, %cst_39 [1] : vector<8x8xf32> to vector<8xf32>
    %86 = vector.shape_cast %85 : vector<8xf32> to vector<8x1xf32>
    %87 = vector.broadcast %86 : vector<8x1xf32> to vector<8x8xf32>
    %88 = arith.subf %84, %87 : vector<8x8xf32>
    %89 = math.exp %88 : vector<8x8xf32>
    %cst_40 = arith.constant dense<0.000000e+00> : vector<8xf32>
    %90 = vector.multi_reduction <add>, %89, %cst_40 [1] : vector<8x8xf32> to vector<8xf32>
    %91 = vector.shape_cast %90 : vector<8xf32> to vector<8x1xf32>
    %92 = tpu.reciprocal %91 : vector<8x1xf32> -> vector<8x1xf32>
    %93 = vector.broadcast %92 : vector<8x1xf32> to vector<8x8xf32>
    %94 = arith.mulf %89, %93 : vector<8x8xf32>
    %cst_41 = arith.constant dense<0.000000e+00> : vector<8x4xf32>
    %95 = tpu.matmul %94, %83, %cst_41 {dimension_numbers = #tpu.dot_dimension_numbers<[1], [0], [0], [1], [0, 0, 1, 1], [], []>} : vector<8x8xf32>, vector<8x4xf32>, vector<8x4xf32> -> vector<8x4xf32>
    %96 = vector.extract_strided_slice %10 {offsets = [0, 20], sizes = [8, 4], strides = [1, 1]} : vector<8x32xf32> to vector<8x4xf32>
    %97 = vector.extract_strided_slice %15 {offsets = [0, 20], sizes = [8, 4], strides = [1, 1]} : vector<8x32xf32> to vector<8x4xf32>
    %98 = vector.extract_strided_slice %20 {offsets = [0, 20], sizes = [8, 4], strides = [1, 1]} : vector<8x32xf32> to vector<8x4xf32>
    %cst_42 = arith.constant dense<0.000000e+00> : vector<8x8xf32>
    %99 = tpu.matmul %96, %97, %cst_42 {dimension_numbers = #tpu.dot_dimension_numbers<[1], [1], [0], [0], [0, 0, 1, 0], [], []>} : vector<8x4xf32>, vector<8x4xf32>, vector<8x8xf32> -> vector<8x8xf32>
    %cst_43 = arith.constant dense<0xFF800000> : vector<8xf32>
    %100 = vector.multi_reduction <maximumf>, %99, %cst_43 [1] : vector<8x8xf32> to vector<8xf32>
    %101 = vector.shape_cast %100 : vector<8xf32> to vector<8x1xf32>
    %102 = vector.broadcast %101 : vector<8x1xf32> to vector<8x8xf32>
    %103 = arith.subf %99, %102 : vector<8x8xf32>
    %104 = math.exp %103 : vector<8x8xf32>
    %cst_44 = arith.constant dense<0.000000e+00> : vector<8xf32>
    %105 = vector.multi_reduction <add>, %104, %cst_44 [1] : vector<8x8xf32> to vector<8xf32>
    %106 = vector.shape_cast %105 : vector<8xf32> to vector<8x1xf32>
    %107 = tpu.reciprocal %106 : vector<8x1xf32> -> vector<8x1xf32>
    %108 = vector.broadcast %107 : vector<8x1xf32> to vector<8x8xf32>
    %109 = arith.mulf %104, %108 : vector<8x8xf32>
    %cst_45 = arith.constant dense<0.000000e+00> : vector<8x4xf32>
    %110 = tpu.matmul %109, %98, %cst_45 {dimension_numbers = #tpu.dot_dimension_numbers<[1], [0], [0], [1], [0, 0, 1, 1], [], []>} : vector<8x8xf32>, vector<8x4xf32>, vector<8x4xf32> -> vector<8x4xf32>
    %111 = vector.extract_strided_slice %10 {offsets = [0, 24], sizes = [8, 4], strides = [1, 1]} : vector<8x32xf32> to vector<8x4xf32>
    %112 = vector.extract_strided_slice %15 {offsets = [0, 24], sizes = [8, 4], strides = [1, 1]} : vector<8x32xf32> to vector<8x4xf32>
    %113 = vector.extract_strided_slice %20 {offsets = [0, 24], sizes = [8, 4], strides = [1, 1]} : vector<8x32xf32> to vector<8x4xf32>
    %cst_46 = arith.constant dense<0.000000e+00> : vector<8x8xf32>
    %114 = tpu.matmul %111, %112, %cst_46 {dimension_numbers = #tpu.dot_dimension_numbers<[1], [1], [0], [0], [0, 0, 1, 0], [], []>} : vector<8x4xf32>, vector<8x4xf32>, vector<8x8xf32> -> vector<8x8xf32>
    %cst_47 = arith.constant dense<0xFF800000> : vector<8xf32>
    %115 = vector.multi_reduction <maximumf>, %114, %cst_47 [1] : vector<8x8xf32> to vector<8xf32>
    %116 = vector.shape_cast %115 : vector<8xf32> to vector<8x1xf32>
    %117 = vector.broadcast %116 : vector<8x1xf32> to vector<8x8xf32>
    %118 = arith.subf %114, %117 : vector<8x8xf32>
    %119 = math.exp %118 : vector<8x8xf32>
    %cst_48 = arith.constant dense<0.000000e+00> : vector<8xf32>
    %120 = vector.multi_reduction <add>, %119, %cst_48 [1] : vector<8x8xf32> to vector<8xf32>
    %121 = vector.shape_cast %120 : vector<8xf32> to vector<8x1xf32>
    %122 = tpu.reciprocal %121 : vector<8x1xf32> -> vector<8x1xf32>
    %123 = vector.broadcast %122 : vector<8x1xf32> to vector<8x8xf32>
    %124 = arith.mulf %119, %123 : vector<8x8xf32>
    %cst_49 = arith.constant dense<0.000000e+00> : vector<8x4xf32>
    %125 = tpu.matmul %124, %113, %cst_49 {dimension_numbers = #tpu.dot_dimension_numbers<[1], [0], [0], [1], [0, 0, 1, 1], [], []>} : vector<8x8xf32>, vector<8x4xf32>, vector<8x4xf32> -> vector<8x4xf32>
    %126 = vector.extract_strided_slice %10 {offsets = [0, 28], sizes = [8, 4], strides = [1, 1]} : vector<8x32xf32> to vector<8x4xf32>
    %127 = vector.extract_strided_slice %15 {offsets = [0, 28], sizes = [8, 4], strides = [1, 1]} : vector<8x32xf32> to vector<8x4xf32>
    %128 = vector.extract_strided_slice %20 {offsets = [0, 28], sizes = [8, 4], strides = [1, 1]} : vector<8x32xf32> to vector<8x4xf32>
    %cst_50 = arith.constant dense<0.000000e+00> : vector<8x8xf32>
    %129 = tpu.matmul %126, %127, %cst_50 {dimension_numbers = #tpu.dot_dimension_numbers<[1], [1], [0], [0], [0, 0, 1, 0], [], []>} : vector<8x4xf32>, vector<8x4xf32>, vector<8x8xf32> -> vector<8x8xf32>
    %cst_51 = arith.constant dense<0xFF800000> : vector<8xf32>
    %130 = vector.multi_reduction <maximumf>, %129, %cst_51 [1] : vector<8x8xf32> to vector<8xf32>
    %131 = vector.shape_cast %130 : vector<8xf32> to vector<8x1xf32>
    %132 = vector.broadcast %131 : vector<8x1xf32> to vector<8x8xf32>
    %133 = arith.subf %129, %132 : vector<8x8xf32>
    %134 = math.exp %133 : vector<8x8xf32>
    %cst_52 = arith.constant dense<0.000000e+00> : vector<8xf32>
    %135 = vector.multi_reduction <add>, %134, %cst_52 [1] : vector<8x8xf32> to vector<8xf32>
    %136 = vector.shape_cast %135 : vector<8xf32> to vector<8x1xf32>
    %137 = tpu.reciprocal %136 : vector<8x1xf32> -> vector<8x1xf32>
    %138 = vector.broadcast %137 : vector<8x1xf32> to vector<8x8xf32>
    %139 = arith.mulf %134, %138 : vector<8x8xf32>
    %cst_53 = arith.constant dense<0.000000e+00> : vector<8x4xf32>
    %140 = tpu.matmul %139, %128, %cst_53 {dimension_numbers = #tpu.dot_dimension_numbers<[1], [0], [0], [1], [0, 0, 1, 1], [], []>} : vector<8x8xf32>, vector<8x4xf32>, vector<8x4xf32> -> vector<8x4xf32>
    %141 = tpu.concatenate %35, %50, %65, %80, %95, %110, %125, %140 in 1 : vector<8x4xf32>, vector<8x4xf32>, vector<8x4xf32>, vector<8x4xf32>, vector<8x4xf32>, vector<8x4xf32>, vector<8x4xf32>, vector<8x4xf32> -> vector<8x32xf32>
    %c0_54 = arith.constant 0 : index
    %c0_55 = arith.constant 0 : index
    %142 = vector.load %arg11[%c0_54, %c0_55] : memref<32x32xf32, #tpu.memory_space<vmem>>, vector<32x32xf32>
    %cst_56 = arith.constant dense<0.000000e+00> : vector<8x32xf32>
    %143 = tpu.matmul %141, %142, %cst_56 {dimension_numbers = #tpu.dot_dimension_numbers<[1], [0], [0], [1], [0, 0, 1, 1], [], []>} : vector<8x32xf32>, vector<32x32xf32>, vector<8x32xf32> -> vector<8x32xf32>
    %c0_57 = arith.constant 0 : index
    %c0_58 = arith.constant 0 : index
    %c0_59 = arith.constant 0 : index
    %144 = vector.load %arg12[%c0_57, %c0_58, %c0_59] : memref<1x8x32xf32, #tpu.memory_space<vmem>>, vector<1x8x32xf32>
    %145 = vector.shape_cast %144 : vector<1x8x32xf32> to vector<8x32xf32>
    %146 = vector.shape_cast %143 : vector<8x32xf32> to vector<1x8x32xf32>
    tpu.vector_store %arg12[%c0_57, %c0_58, %c0_59], %146 {strides = array<i32>} : memref<1x8x32xf32, #tpu.memory_space<vmem>>, vector<1x8x32xf32>,
    return
  }
  func.func @transform_0(%arg0: i32, %arg1: i32) -> (i32, i32, i32) {
    %c0_i32 = arith.constant 0 : i32
    %c0_i32_0 = arith.constant 0 : i32
    return %arg0, %arg1, %c0_i32 : i32, i32, i32
  }
  func.func @transform_1(%arg0: i32, %arg1: i32) -> (i32, i32, i32) {
    %c0_i32 = arith.constant 0 : i32
    %c0_i32_0 = arith.constant 0 : i32
    %c0_i32_1 = arith.constant 0 : i32
    return %arg0, %c0_i32, %c0_i32_0 : i32, i32, i32
  }
  func.func @transform_2(%arg0: i32, %arg1: i32) -> (i32, i32, i32) {
    %c0_i32 = arith.constant 0 : i32
    %c0_i32_0 = arith.constant 0 : i32
    %c0_i32_1 = arith.constant 0 : i32
    return %arg0, %c0_i32, %c0_i32_0 : i32, i32, i32
  }
  func.func @transform_3(%arg0: i32, %arg1: i32) -> (i32, i32) {
    %c0_i32 = arith.constant 0 : i32
    %c0_i32_0 = arith.constant 0 : i32
    %c0_i32_1 = arith.constant 0 : i32
    return %c0_i32, %c0_i32_0 : i32, i32
  }
  func.func @transform_4(%arg0: i32, %arg1: i32) -> (i32, i32) {
    %c0_i32 = arith.constant 0 : i32
    %c0_i32_0 = arith.constant 0 : i32
    %c0_i32_1 = arith.constant 0 : i32
    return %c0_i32, %c0_i32_0 : i32, i32
  }
  func.func @transform_5(%arg0: i32, %arg1: i32) -> (i32, i32) {
    %c0_i32 = arith.constant 0 : i32
    %c0_i32_0 = arith.constant 0 : i32
    %c0_i32_1 = arith.constant 0 : i32
    return %c0_i32, %c0_i32_0 : i32, i32
  }
  func.func @transform_6(%arg0: i32, %arg1: i32) -> (i32, i32) {
    %c0_i32 = arith.constant 0 : i32
    %c0_i32_0 = arith.constant 0 : i32
    %c0_i32_1 = arith.constant 0 : i32
    return %c0_i32, %c0_i32_0 : i32, i32
  }
  func.func @transform_7(%arg0: i32, %arg1: i32) -> (i32, i32) {
    %c0_i32 = arith.constant 0 : i32
    %c0_i32_0 = arith.constant 0 : i32
    %c0_i32_1 = arith.constant 0 : i32
    return %c0_i32, %c0_i32_0 : i32, i32
  }
  func.func @transform_8(%arg0: i32, %arg1: i32) -> (i32, i32) {
    %c0_i32 = arith.constant 0 : i32
    %c0_i32_0 = arith.constant 0 : i32
    %c0_i32_1 = arith.constant 0 : i32
    return %c0_i32, %c0_i32_0 : i32, i32
  }
  func.func @transform_9(%arg0: i32, %arg1: i32) -> (i32, i32) {
    %c0_i32 = arith.constant 0 : i32
    %c0_i32_0 = arith.constant 0 : i32
    %c0_i32_1 = arith.constant 0 : i32
    return %c0_i32, %c0_i32_0 : i32, i32
  }
  func.func @transform_10(%arg0: i32, %arg1: i32) -> (i32, i32, i32) {
    %c0_i32 = arith.constant 0 : i32
    %c0_i32_0 = arith.constant 0 : i32
    return %arg0, %arg1, %c0_i32 : i32, i32, i32
  }
}

</mosaic_0001>

<bundles_post_ra>
// kernel: tpu_custom_call.1
= control target key start
LH: loop header
LB: loop body
LE: loop exit
PB: predicated region body
PF: predicated region fallthrough
CT: control target
= control target key end

     0   :  { %s3611_s0 = inlined_call_operand.hbm [shape: f32[2,8,32], index: 0, kind: input, shape index: {}]   ;;  %s3612_s1 = inlined_call_operand.hbm [shape: f32[2,8,32], index: 1, kind: input, shape index: {}]   ;;  %s3613_s2 = inlined_call_operand.hbm [shape: f32[2,8,32], index: 2, kind: input, shape index: {}]   ;;  %s3614_s3 = inlined_call_operand.hbm [shape: f32[32,32], index: 3, kind: input, shape index: {}]   ;;  %s3615_s4 = inlined_call_operand.vmem [shape: f32[1,32], index: 4, kind: input, shape index: {}]   ;;  %s3616_s5 = inlined_call_operand.hbm [shape: f32[32,32], index: 5, kind: input, shape index: {}]   ;;  %s3617_s6 = inlined_call_operand.vmem [shape: f32[1,32], index: 6, kind: input, shape index: {}]   ;;  %s3618_s7 = inlined_call_operand.hbm [shape: f32[32,32], index: 7, kind: input, shape index: {}]   ;;  %s3619_s8 = inlined_call_operand.vmem [shape: f32[1,32], index: 8, kind: input, shape index: {}]   ;;  %s3620_s9 = inlined_call_operand.hbm [shape: f32[32,32], index: 9, kind: input, shape index: {}]   ;;  %s3621_s10 = inlined_call_operand.hbm [shape: f32[2,8,32], index: 10, kind: output, shape index: {}]  }
   0x1   :  { %3640 = sst [smem:[#allocation27_spill]] %s3612_s1 }
   0x2   :  { %3641 = sst [smem:[#allocation28_spill]] %s3614_s3 }
   0x3   :  { %3642 = sst [smem:[#allocation29_spill]] %s3616_s5 }
   0x4   :  { %3643 = sst [smem:[#allocation30_spill]] %s3618_s7 }
   0x5   :  { %3644 = sst [smem:[#allocation31_spill]] %s3621_s10 }
   0x6   :  { %15 = vsyncpa [#allocation3], 0 }
   0x7   :  { %17 = vsyncpa [#allocation3 + $0x1], 0 }
   0x8   :  { %18 = vsyncpa [#allocation6], 0 }
   0x9   :  { %20 = vsyncpa [#allocation6 + $0x1], 0 }
   0xa   :  { %21 = vsyncpa [#allocation9], 0 }
   0xb   :  { %22 = vsyncpa [#allocation12], 0 }
   0xc   :  { %23 = vsyncpa [#allocation4], 0 }
   0xd   :  { %25 = vsyncpa [#allocation4 + $0x1], 0  ;;  %s3149_s13 = smov 0   ;;  %s3151_s14 = smov 0  }
   0xe   :  { %s3153_s15 = smov 0   ;;  %s3155_s16 = smov 0  }
   0xf   :  { %s3157_s17 = smov 0   ;;  %s3159_s18 = smov 0  }
  0x10 LB: > { %3645 = sst [smem:[#allocation20_spill]] %s3046_s13  ;;  %s3180_s19 = sadd.s32 4294967295, %s3066_s18   ;;  %s3066_s18 = sphi %s3159_s18, %s31_s18   ;;  %s3062_s17 = sphi %s3157_s17, %s3684_s17   ;;  %s3058_s16 = sphi %s3155_s16, %s3683_s16   ;;  %s3054_s15 = sphi %s3153_s15, %s3687_s15   ;;  %s3050_s14 = sphi %s3151_s14, %s3686_s14   ;;  %s3046_s13 = sphi %s3149_s13, %s3685_s13  }
  0x11   : > { %3646 = sst [smem:[#allocation21_spill]] %s3062_s17  ;;  %p2391_p0 = scmp.ge.s32.totalorder %s3066_s18, 1 }
  0x12   : > { %3647 = sst [smem:[#allocation22_spill]] %s3066_s18  ;;  %p3633_p1 = scmp.eq.s32.totalorder %s3180_s19, 0 }
  0x13   : > { %p303_p2 = scmp.lt.s32.totalorder %s3066_s18, 3  ;;  %s3068_s21 = smov [#allocation8]  }
  0x14   : > { %s315_s22 = sshll.u32 %s3068_s21, 4  ;;  %s3069_s24 = smov [#allocation11]   ;;  %s316_s22 = int_to_ptr.vmem [resolvable:$true] %s315_s22 }
  0x15   : > { %p3185_p3 = pnand %p2391_p0, %p303_p2  ;;  %s347_s25 = sshll.u32 %s3069_s24, 4  ;;  %s348_s25 = int_to_ptr.vmem [resolvable:$true] %s347_s25 }
  0x16   : > { %s2797_s26 = scalar_lea.vmem %s316_s22, 512  ;;  %p2805_p11 = scmp.lt.s32.totalorder %s316_s22, %s316_s22 }
  0x17   : > { %p2647_p4 = pneg %p3185_p3  ;;  %p2798_p8 = scmp.ne.s32.totalorder %s316_s22, %s2797_s26 }
  0x18   : > { %p2806_p12 = scmp.lt.s32.totalorder %s2797_s26, %s2797_s26 }
  0x19   : > { %p3194_p6 = pnand %p2647_p4, %p3633_p1 }
  0x1a   : > { %p2807_p13 = por %p2806_p12, %p2805_p11 }
  0x1b   : > { %p3634_p7 = pneg %p3194_p6 }
  0x1d   : > { %p2800_p9 = pnand %p2798_p8, %p3634_p7 }
  0x1f   : > { %p2801_p10 = pneg %p2800_p9 }
  0x21   : > { %p2808_p0 = pnand %p2807_p13, %p2801_p10 }
  0x23   : > { %2811 = shalt.err (!%p2808_p0)
}
  0x24   : > { %s3622_s27 = smov 128   ;;  %s3624_s28 = smov 8  }
  0x25   : > { %s3650_s3 = sld [smem:[#allocation28_spill]]  ;;  %s2823_s11 = scalar_lea.vmem %s348_s25, 512 }
  0x26   : > { %p2824_p2 = scmp.ne.s32.totalorder %s348_s25, %s2823_s11  ;;  %p2831_p9 = scmp.lt.s32.totalorder %s348_s25, %s348_s25 }
  0x27   : > { %p2832_p10 = scmp.lt.s32.totalorder %s2823_s11, %s2823_s11 }
  0x28   : > { %p2826_p4 = pnand %p2824_p2, %p3634_p7 }
  0x29   : > { %p2833_p11 = por %p2832_p10, %p2831_p9 }
  0x2a   : > { %p2827_p8 = pneg %p2826_p4 }
  0x2b   : > { %2650 = dma.hbm_to_vmem [thread:$0]  (!%p3194_p6), %s3650_s3, 512, %s316_s22, [#allocation9], %s3622_s27, %s3622_s27, %s3624_s28  }
  0x2c   : > { %p2834_p12 = pnand %p2833_p11, %p2827_p8 }
  0x2e   : > { %2837 = shalt.err (!%p2834_p12)
}
  0x2f   : > { %s3651_s7 = sld [smem:[#allocation30_spill]]  ;;  %s2390_s22 = sadd.s32 4294967294, %s3066_s18  }
  0x30   : > { %s43_s24 = sadd.s32 1, %s3062_s17  ;;  %s52_s26 = sadd.s32 1, %s3054_s15 }
  0x31   : > { %p45_p13 = scmp.ge.s32.totalorder %s43_s24, 2  ;;  %p59_p0 = scmp.ne.s32.totalorder %s3054_s15, %s3050_s14 }
  0x32   : > { %p60_p2 = scmp.eq.s32.totalorder %s3066_s18, 0  ;;  %p65_p8 = scmp.ne.s32.totalorder %s3050_s14, %s3046_s13 }
  0x33   : > { %s3689_s24 = smov (%p45_p13, %s43_s24), 0  ;;  %p290_p9 = scmp.eq.s32.totalorder %s3180_s19, 1 }
  0x34   : > { %3652 = sst [smem:[#allocation23_spill]] %s3689_s24  ;;  %p3230_p4 = por %p60_p2, %p59_p0 }
  0x35   : > { %2656 = dma.hbm_to_vmem [thread:$0]  (!%p3194_p6), %s3651_s7, 512, %s348_s25, [#allocation12], %s3622_s27, %s3622_s27, %s3624_s28  }
  0x36   : > { %s47_s25 = ssub.s32 %s3062_s17, %s3689_s24  ;;  %p3241_p11 = por %p3633_p1, %p65_p8 }
  0x37   : > { %p50_p10 = scmp.eq.s32.totalorder %s47_s25, 0  ;;  %p3245_p12 = por %p290_p9, %p59_p0 }
  0x38   : > { %p296_p13 = scmp.eq.s32.totalorder %s2390_s22, 1  ;;  %p2678_p5 = scmp.lt.s32.totalorder %s3066_s18, 2 }
  0x39   : > { %s3655_s11 = scalar_select %p3245_p12, 1, 0 }
  0x3a   : > { %s3250_s12 = scalar_select %p50_p10, %s3054_s15, %s52_s26  }
  0x3b   : > { %3656 = sst [smem:[#allocation24_spill]] %s3655_s11  ;;  %p3252_p2 = por %p296_p13, %p65_p8 }
  0x3c   : > { %3657 = sst [smem:[#allocation25_spill]] %s3250_s12  ;;  %s3629_s27 = sand.u32 1, %s3054_s15  }
  0x3d   : > { %s3658_s21 = scalar_select %p3252_p2, 1, 0 }
  0x3e   : > { %s3259_s28 = sshll.u32 %s3062_s17, 7  ;;  %s3263_s25 = sshll.u32 %s3629_s27, 3 }
  0x3f   : > { %3659 = sst [smem:[#allocation26_spill]] %s3658_s21  ;;  %p3267_p0 = pnand %p2678_p5, %p3230_p4 }
  0x40   : > { %s396_s22 = sand.u32 1, %s3066_s18   ;;  %s3661_s1 = sld [smem:[#allocation27_spill]] }
  0x41   : > { %s400_s12 = scalar_lea.vmem [#allocation5], %s3263_s25  ;;  %s3277_s21 = scalar_lea.sflag [#allocation6], %s396_s22 }
  0x42   : > { %s407_s17 = sshll.u32 %s400_s12, 4  ;;  %p3635_p8 = pneg %p3267_p0  ;;  %s408_s17 = int_to_ptr.vmem [resolvable:$true] %s407_s17 }
  0x43   : > { %s2851_s29 = scalar_lea.vmem %s408_s17, 128  ;;  %s3072_s27 = smov [#allocation5]  }
  0x44   : > { %p2852_p9 = scmp.ne.s32.totalorder %s408_s17, %s2851_s29  ;;  %s2856_s13 = sshll.u32 %s3072_s27, 4  ;;  %s2857_s13 = int_to_ptr.vmem [resolvable:$false] %s2856_s13 }
  0x45   : > { %s2858_s18 = scalar_lea.vmem %s2857_s13, 256  ;;  %p2859_p10 = scmp.lt.s32.totalorder %s408_s17, %s2857_s13 }
  0x46   : > { %s405_s24 = scalar_lea.hbm %s3661_s1, %s3259_s28  ;;  %p2854_p5 = pnand %p2852_p9, %p3635_p8 }
  0x47   : > { %p2860_p13 = scmp.lt.s32.totalorder %s2858_s18, %s2851_s29 }
  0x48   : > { %p2855_p4 = pneg %p2854_p5 }
  0x49   : > { %p2861_p1 = por %p2860_p13, %p2859_p10 }
  0x4b   : > { %p2862_p7 = pnand %p2861_p1, %p2855_p4 }
  0x4d   : > { %2865 = shalt.err (!%p2862_p7)
}
  0x4e   : > { %2666 = dma.hbm_to_vmem [thread:$0]  (!%p3267_p0), %s405_s24, 128, %s408_s17, %s3277_s21  }
  0x4f   : > { %s3073_s7 = smov [#allocation10]   ;;  %s3074_s22 = smov [#allocation13]  }
  0x50   : > { %s331_s12 = sshll.u32 %s3073_s7, 4  ;;  %s363_s26 = sshll.u32 %s3074_s22, 4  ;;  %s332_s12 = int_to_ptr.vmem [resolvable:$true] %s331_s12  ;;  %s364_s26 = int_to_ptr.vmem [resolvable:$true] %s363_s26 }
  0x51   : > { %s2877_s1 = scalar_lea.vmem %s332_s12, 512  ;;  %p3662_p5 = pneg %p3194_p6 }
  0x52   : > { %p2878_p9 = scmp.ne.s32.totalorder %s332_s12, %s2877_s1  ;;  %p2885_p12 = scmp.lt.s32.totalorder %s332_s12, %s332_s12 }
  0x53   : > { %p2886_p10 = scmp.lt.s32.totalorder %s2877_s1, %s2877_s1 }
  0x54   : > { %p2880_p8 = pnand %p2878_p9, %p3662_p5 }
  0x55   : > { %p2887_p1 = por %p2886_p10, %p2885_p12 }
  0x56   : > { %p2881_p2 = pneg %p2880_p8 }
  0x58   : > { %p2888_p7 = pnand %p2887_p1, %p2881_p2 }
  0x5a   : > { %2891 = shalt.err (!%p2888_p7)
}
  0x5b   : > { %s3663_s13 = smov 8   ;;  %s3664_s17 = smov 128  }
  0x5c   : > { %s3665_s5 = sld [smem:[#allocation29_spill]]  ;;  %s2903_s24 = scalar_lea.vmem %s364_s26, 512 }
  0x5d   : > { %p2904_p4 = scmp.ne.s32.totalorder %s364_s26, %s2903_s24  ;;  %p3666_p8 = pmov %p3662_p5 }
  0x5e   : > { %p2911_p12 = scmp.lt.s32.totalorder %s364_s26, %s364_s26  ;;  %p2912_p2 = scmp.lt.s32.totalorder %s2903_s24, %s2903_s24 }
  0x5f   : > { %p2906_p13 = pnand %p2904_p4, %p3666_p8 }
  0x60   : > { %p2913_p5 = por %p2912_p2, %p2911_p12 }
  0x61   : > { %p2907_p9 = pneg %p2906_p13 }
  0x62   : > { %2653 = dma.hbm_to_vmem [thread:$0]  (!%p3194_p6), %s3665_s5, 512, %s332_s12, [#allocation9], %s3664_s17, %s3664_s17, %s3663_s13  }
  0x63   : > { %p2914_p10 = pnand %p2913_p5, %p2907_p9 }
  0x65   : > { %2917 = shalt.err (!%p2914_p10)
}
  0x66   : > { %2659 = dma.hbm_to_vmem [thread:$0]  (!%p3194_p6), %s3620_s9, 512, %s364_s26, [#allocation12], %s3664_s17, %s3664_s17, %s3663_s13  }
  0x67   : > { %s387_s22 = scalar_lea.hbm %s3611_s0, %s3259_s28  ;;  %s381_s18 = scalar_lea.vmem [#allocation2], %s3263_s25 }
  0x68   : > { %s389_s27 = sshll.u32 %s381_s18, 4  ;;  %s423_s5 = scalar_lea.hbm %s3613_s2, %s3259_s28  ;;  %s390_s27 = int_to_ptr.vmem [resolvable:$true] %s389_s27 }
  0x69   : > { %s3667_s10 = sand.u32 1, %s3054_s15   ;;  %s2931_s1 = scalar_lea.vmem %s390_s27, 128 }
  0x6a   : > { %s378_s11 = scalar_lea.sflag [#allocation3], %s3667_s10  ;;  %p2932_p1 = scmp.ne.s32.totalorder %s390_s27, %s2931_s1 }
  0x6b   : > { %p3668_p7 = pneg %p3267_p0  ;;  %s3075_s26 = smov [#allocation2]  }
  0x6c   : > { %s2936_s13 = sshll.u32 %s3075_s26, 4  ;;  %s2937_s13 = int_to_ptr.vmem [resolvable:$false] %s2936_s13 }
  0x6d   : > { %p2934_p4 = pnand %p2932_p1, %p3668_p7  ;;  %s2938_s17 = scalar_lea.vmem %s2937_s13, 256 }
  0x6e   : > { %p2939_p6 = scmp.lt.s32.totalorder %s390_s27, %s2937_s13  ;;  %p2940_p13 = scmp.lt.s32.totalorder %s2938_s17, %s2931_s1 }
  0x6f   : > { %p2935_p8 = pneg %p2934_p4 }
  0x70   : > { %p2941_p9 = por %p2940_p13, %p2939_p6 }
  0x72   : > { %p2942_p12 = pnand %p2941_p9, %p2935_p8 }
  0x74   : > { %2945 = shalt.err (!%p2942_p12)
}
  0x75   : > { %2663 = dma.hbm_to_vmem [thread:$0]  (!%p3267_p0), %s387_s22, 128, %s390_s27, %s378_s11  }
  0x76   : > { %s418_s10 = scalar_lea.vmem [#allocation7], %s3263_s25  ;;  %p3669_p5 = pmov %p3668_p7 }
  0x77   : > { %s425_s29 = sshll.u32 %s418_s10, 4  ;;  %s3076_s12 = smov [#allocation7]   ;;  %s426_s29 = int_to_ptr.vmem [resolvable:$true] %s425_s29 }
  0x78   : > { %s2959_s7 = scalar_lea.vmem %s426_s29, 128  ;;  %s2964_s18 = sshll.u32 %s3076_s12, 4  ;;  %s2965_s18 = int_to_ptr.vmem [resolvable:$false] %s2964_s18 }
  0x79   : > { %p2960_p2 = scmp.ne.s32.totalorder %s426_s29, %s2959_s7  ;;  %s2966_s23 = scalar_lea.vmem %s2965_s18, 256 }
  0x7a   : > { %p2967_p7 = scmp.lt.s32.totalorder %s426_s29, %s2965_s18  ;;  %p2968_p4 = scmp.lt.s32.totalorder %s2966_s23, %s2959_s7 }
  0x7b   : > { %p2962_p10 = pnand %p2960_p2, %p3669_p5 }
  0x7c   : > { %p2969_p8 = por %p2968_p4, %p2967_p7 }
  0x7d   : > { %p2963_p1 = pneg %p2962_p10 }
  0x7f   : > { %p2970_p6 = pnand %p2969_p8, %p2963_p1 }
  0x81   : > { %2973 = shalt.err (!%p2970_p6)
}
  0x82   : > { %2669 = dma.hbm_to_vmem [thread:$0]  (!%p3267_p0), %s423_s5, 128, %s426_s29, %s3277_s21  }
  0x83   : > { %434 = sbr.rel (%p3185_p3) target bundleno = 1969 (0x7b1), region = 60  ;;  %s3340_s22 = sand.u32 (!%p3185_p3), 1, %s3050_s14  }
  0x84   : > { %s3343_s27 = sshll.u32 (!%p3185_p3), %s3340_s22, 3  ;;  %s437_s3 = scalar_lea.sflag (!%p3185_p3), [#allocation3], %s3340_s22 }
  0x85   : > { %s440_s24 = scalar_lea.vmem (!%p3185_p3), [#allocation2], %s3343_s27 }
  0x88   : > { %3025 = dma.done.wait (%p3241_p11), %s437_s3, 128  }
  0x89   : > { %3027 = vsyncadd (%p3241_p11), %s437_s3, 4294967168  ;;  %s445_s5 = sand.u32 1, %s3180_s19   ;;  %s449_s28 = scalar_lea.vmem [#allocation5], %s3343_s27 }
  0x8a   : > { %s446_s20 = scalar_lea.sflag [#allocation6], %s445_s5 }
  0x8b   : > { %3029 = dma.done.wait (%p3241_p11), %s446_s20, 256  }
  0x8c   : > { %3031 = vsyncadd (%p3241_p11), %s446_s20, 4294967040  ;;  %s458_s21 = scalar_lea.vmem [#allocation7], %s3343_s27  ;;  %p3670_p3 = scmp.eq.s32.totalorder %s3180_s19, 0 }
  0x8e   : > { %3033 = dma.done.wait (%p3670_p3), [#allocation9], 1024   ;;  %p3671_p0 = pmov %p3670_p3 }
  0x90   : > { %3035 = vsyncadd (%p3671_p0), [#allocation9], 4294966272  ;;  %p3672_p13 = pmov %p3671_p0 }
  0x91   : > { %p3673_p9 = pmov %p3671_p0 }
  0x92   : > { %3037 = dma.done.wait (%p3672_p13), [#allocation12], 1024  }
  0x93   : > { %3039 = vsyncadd (%p3673_p9), [#allocation12], 4294966272  ;;  %v3077_v0 = vmov 0.0   ;;  %vm3078_vm0 = vmmov 0   ;;  %v612_v1 = vld [vmem:[#allocation10 + $0x18] sm:$0xff]  ;;  %v611_v3 = vld [vmem:[#allocation10 + $0x10] sm:$0xff] }
  0x94   : > { %2510 = vmatprep.subr.mxu1 %v3077_v0  ;;  %2499 = vmatprep.subr.mxu0 %v3077_v0  ;;  %v527_v2 = vld [vmem:[#allocation8 + $0x18] sm:$0xff]  ;;  %v526_v4 = vld [vmem:[#allocation8 + $0x10] sm:$0xff]  ;;  %v610_v5 = vld [vmem:[#allocation10 + $0x8] sm:$0xff]  ;;  %vm535_vm1 = vcmask 261120   ;;  %vm777_vm2 = vcmask 31744   ;;  %s3079_s13 = smov 124  }
  0x95   : > { %2518 = vmatprep.mubr.msk.f32.mxu1 %vm3078_vm0, %v3077_v0  ;;  %2507 = vmatprep.mubr.msk.f32.mxu0 %vm3078_vm0, %v3077_v0  ;;  %v525_v6 = vld [vmem:[#allocation8 + $0x8] sm:$0xff]  ;;  %v609_v7 = vld [vmem:[#allocation10] sm:$0xff]  ;;  %v521_v10 = vld [vmem:[%s440_s24] sm:$0xff]  ;;  %s3080_s17 = smov 120   ;;  %s3081_s10 = smov 116   ;;  %vm854_vm3 = vcmask 64512  }
  0x96   : > { %2511 = vmatpush3.msra.mxu1 %v612_v1  ;;  %2500 = vmatpush3.msra.mxu0 %v527_v2  ;;  %v524_v8 = vld [vmem:[#allocation8] sm:$0xff]  ;;  %v2414_v11 = vld [vmem:[%s3617_s6] ss:$0 sm:$0xff]  ;;  %s3082_s29 = smov 112   ;;  %s3083_s7 = smov 108   ;;  %v696_v19 = vld [vmem:[#allocation11 + $0x18] sm:$0xff] }
  0x97   : > { %2512 = vmatprep.subr.mxu1 %v3077_v0  ;;  %2501 = vmatprep.subr.mxu0 %v3077_v0  ;;  %v522_v9 = vld [vmem:[%s449_s28] sm:$0xff]  ;;  %v2412_v12 = vld [vmem:[%s3615_s4] ss:$0 sm:$0xff]  ;;  %s3084_s12 = smov 104   ;;  %s3085_s18 = smov 100   ;;  %vm2125_vm4 = vcmask 97280  }
  0x98   : > { %2513 = vmatpush3.msra.mxu1 %v611_v3  ;;  %2502 = vmatpush3.msra.mxu0 %v526_v4  ;;  %v695_v20 = vld [vmem:[#allocation11 + $0x10] sm:$0xff]  ;;  %v694_v21 = vld [vmem:[#allocation11 + $0x8] sm:$0xff]  ;;  %v693_v22 = vld [vmem:[#allocation11] sm:$0xff]  ;;  %s3086_s25 = smov 4   ;;  %s3087_s3 = smov 8   ;;  %vm2127_vm5 = vcmask 130048  }
  0x99   : > { %2514 = vmatprep.subr.mxu1 %v3077_v0  ;;  %2503 = vmatprep.subr.mxu0 %v3077_v0  ;;  %v523_v23 = vld [vmem:[%s458_s21] sm:$0xff]  ;;  %s3088_s24 = smov 12   ;;  %s3089_s5 = smov 16   ;;  %vm2129_vm6 = vcmask 162816   ;;  %vm2131_vm7 = vcmask 195584   ;;  %vm2133_vm8 = vcmask 228352  }
  0x9a   : > { %2515 = vmatpush3.msra.mxu1 %v610_v5  ;;  %2504 = vmatpush3.msra.mxu0 %v525_v6  ;;  %v2416_v32 = vld [vmem:[%s3619_s8] ss:$0 sm:$0xff]  ;;  %s3090_s20 = smov 20   ;;  %s3091_s28 = smov 24  }
  0x9b   : > { %2516 = vmatprep.subr.mxu1 %v3077_v0  ;;  %2505 = vmatprep.subr.mxu0 %v3077_v0  ;;  %s3092_s21 = smov 28   ;;  %s3674_s19 = sld [smem:[#allocation24_spill]] }
  0x9c   : > { %2517 = vmatpush3.msra.mxu1 %v609_v7  ;;  %2506 = vmatpush3.msra.mxu0 %v524_v8  ;;  %s2444_s30 = sshll.u32 %s3058_s16, 7  ;;  %s520_s1 = scalar_lea.vmem [#allocation14], %s3343_s27 }
  0x9d   : > { %2519 = vmatmul.mubr.msk.f32.vlgmr.msra.gmra.mxu1 %vm535_vm1, %v522_v9  ;;  %2508 = vmatmul.mubr.msk.f32.vlgmr.msra.gmra.mxu0 %vm535_vm1, %v521_v10  ;;  %s2228_s26 = sshll.u32 %s520_s1, 4  ;;  %s3093_s16 = smov [#allocation14]   ;;  %s3564_s26 = int_to_ptr.vmem [resolvable:$true] %s2228_s26 }
  0x9e   : > { %2532 = vmatprep.subr.mxu1 %v3077_v0  ;;  %2534 = vmatprep.mubr.msk.f32.mxu1 %vm3078_vm0, %v3077_v0  ;;  %s2978_s27 = sshll.u32 %s3093_s16, 4  ;;  %s2979_s27 = int_to_ptr.vmem [resolvable:$false] %s2978_s27 }
  0x9f   : > { %2521 = vmatprep.subr.mxu0 %v3077_v0  ;;  %2529 = vmatprep.mubr.msk.f32.mxu0 %vm3078_vm0, %v3077_v0  ;;  %p2981_p10 = scmp.lt.s32.totalorder %s3564_s26, %s2979_s27 }
  0xa0   : > { %2522 = vmatpush3.msra.mxu0 %v696_v19 }
  0xa1   : > { %2523 = vmatprep.subr.mxu0 %v3077_v0  ;;  %p3676_p12 = scmp.ne.s32.totalorder %s3674_s19, 0 }
  0xa2   : > { %2524 = vmatpush3.msra.mxu0 %v695_v20 }
  0xa3   : > { %2525 = vmatprep.subr.mxu0 %v3077_v0 }
  0xa4   : > { %2526 = vmatpush3.msra.mxu0 %v694_v21 }
  0xa5   : > { %2527 = vmatprep.subr.mxu0 %v3077_v0 }
  0xa6   : > { %2528 = vmatpush3.msra.mxu0 %v693_v22 }
  0xa7   : > { %2530 = vmatmul.mubr.msk.f32.vlgmr.msra.gmra.mxu0 %vm535_vm1, %v523_v23  ;;  %2552 = vmatprep.subr.mxu0 %v3077_v0 }
  0xa8   : > { %2554 = vmatprep.mubr.msk.f32.mxu0 %vm3078_vm0, %v3077_v0 }
 0x15d   : > { %v689_v13 = vpop.f32.mrf.mxu1  ;;  %v605_v14 = vpop.f32.mrf.mxu0 }
 0x15e   : > { %v690_v15 = vadd.f32 %v2414_v11, %v689_v13  ;;  %v606_v16 = vadd.f32 %v2412_v12, %v605_v14 }
 0x15f   : > { %v2520_v17 = vpop.f32.mrf.mxu1  ;;  %v2509_v18 = vpop.f32.mrf.mxu0 }
 0x160   : > { %941 = vrot.lane.b32.xlu1 %v690_v15, %s3079_s13  ;;  %2533 = vmatpush3.xpose.msk.msra.mxu1 %vm777_vm2, %v690_v15 }
 0x161   : > { %2537 = vmatprep.subr.mxu1 %v3077_v0 }
 0x163   : > { %2535 = vmatmul.mubr.msk.f32.vlgmr.msra.gmra.mxu1 %vm777_vm2, %v606_v16 }
 0x164   : > { %939 = vrot.lane.b32.xlu1 %v606_v16, %s3079_s13  ;;  %2539 = vmatprep.mubr.msk.f32.mxu1 %vm3078_vm0, %v3077_v0 }
 0x167   : > { %v773_v33 = vpop.f32.mrf.mxu0 }
 0x168   : > { %1105 = vrot.lane.b32.xlu1 %v606_v16, %s3080_s17  ;;  %v3426_v34 = vadd.f32 %v2416_v32, %v773_v33 }
 0x169   : > { %v2531_v35 = vpop.f32.mrf.mxu0 }
 0x16a   : > { %2538 = vmatpush3.msra.mxu1 %v3426_v34 }
 0x16b   : > { %2542 = vmatprep.subr.mxu1 %v3077_v0 }
 0x16c   : > { %1272 = vrot.lane.b32.xlu1 %v690_v15, %s3081_s10 }
 0x170   : > { %1270 = vrot.lane.b32.xlu1 %v606_v16, %s3081_s10 }
 0x174   : > { %1437 = vrot.lane.b32.xlu1 %v690_v15, %s3082_s29 }
 0x178   : > { %1435 = vrot.lane.b32.xlu1 %v606_v16, %s3082_s29 }
 0x17c   : > { %1602 = vrot.lane.b32.xlu1 %v690_v15, %s3083_s7 }
 0x180   : > { %1767 = vrot.lane.b32.xlu1 %v690_v15, %s3084_s12 }
 0x184   : > { %1932 = vrot.lane.b32.xlu1 %v690_v15, %s3085_s18 }
 0x1d2   : > { %v942_v36 = vpop.permute.xlu1 %941 }
 0x1d6   : > { %v940_v37 = vpop.permute.xlu1 %939 }
 0x1da   : > { %v1106_v38 = vpop.permute.xlu1 %1105 }
 0x1de   : > { %v1273_v39 = vpop.permute.xlu1 %1272 }
 0x1e2   : > { %v1271_v40 = vpop.permute.xlu1 %1270 }
 0x1e6   : > { %v1438_v41 = vpop.permute.xlu1 %1437 }
 0x1ea   : > { %v1436_v44 = vpop.permute.xlu1 %1435 }
 0x1ee   : > { %v1603_v45 = vpop.permute.xlu1 %1602 }
 0x1f2   : > { %v1768_v49 = vpop.permute.xlu1 %1767 }
 0x1f6   : > { %v1933_v51 = vpop.permute.xlu1 %1932 }
 0x223   : > { %v850_v24 = vpop.f32.mrf.mxu1 }
 0x224   : > { %v855_v25 = vsel %vm854_vm3, %v850_v24, -inf }
 0x225   : > { %856 = vmax.xlane.f32.xlu0 %v855_v25  ;;  %v2536_v26 = vpop.f32.mrf.mxu1 }
 0x2ae   : > { %v857_v27 = vpop.xlane.xlu0 %856 }
 0x2af   : > { %v858_v28 = vsub.f32 %v850_v24, %v857_v27 }
 0x2b1   : > { %v859_v29 = vmul.f32 1.442695, %v858_v28 }
 0x2b3   : > { %2754 = vpow2.f32 %v859_v29 }
 0x2c0   : > { %v2755_v30 = vpop.eup %2754 }
 0x2c1   : > { %v861_v31 = vsel %vm854_vm3, %v2755_v30, 0.0 }
 0x2c2   : > { %862 = vadd.xlane.f32.xlu0 %v861_v31 }
 0x2d8   : > { %1107 = vrot.lane.b32.xlu0 %v690_v15, %s3080_s17 }
 0x2dc   : > { %1600 = vrot.lane.b32.xlu0 %v606_v16, %s3083_s7 }
 0x2e0   : > { %1765 = vrot.lane.b32.xlu0 %v606_v16, %s3084_s12 }
 0x2e4   : > { %1930 = vrot.lane.b32.xlu0 %v606_v16, %s3085_s18 }
 0x34b   : > { %v863_v42 = vpop.xlane.xlu0 %862 }
 0x34c   : > { %2756 = vrcp.f32 %v863_v42 }
 0x34f   : > { %v1108_v43 = vpop.permute.xlu0 %1107 }
 0x350   : > { %2553 = vmatpush3.xpose.msk.msra.mxu0 %vm777_vm2, %v1108_v43 }
 0x351   : > { %2562 = vmatprep.subr.mxu0 %v3077_v0 }
 0x353   : > { %2555 = vmatmul.mubr.msk.f32.vlgmr.msra.gmra.mxu0 %vm777_vm2, %v1106_v38  ;;  %v1601_v47 = vpop.permute.xlu0 %1600 }
 0x354   : > { %2563 = vmatpush3.xpose.msk.msra.mxu0 %vm777_vm2, %v1273_v39  ;;  %2564 = vmatprep.mubr.msk.f32.mxu0 %vm3078_vm0, %v3077_v0 }
 0x355   : > { %2572 = vmatprep.subr.mxu0 %v3077_v0 }
 0x357   : > { %2565 = vmatmul.mubr.msk.f32.vlgmr.msra.gmra.mxu0 %vm777_vm2, %v1271_v40  ;;  %v1766_v50 = vpop.permute.xlu0 %1765 }
 0x358   : > { %2573 = vmatpush3.xpose.msk.msra.mxu0 %vm777_vm2, %v1438_v41  ;;  %2574 = vmatprep.mubr.msk.f32.mxu0 %vm3078_vm0, %v3077_v0 }
 0x359   : > { %v2757_v46 = vpop.eup %2756  ;;  %2582 = vmatprep.subr.mxu0 %v3077_v0 }
 0x35a   : > { %v865_v48 = vmul.f32 %v2757_v46, %v2755_v30 }
 0x35b   : > { %2575 = vmatmul.mubr.msk.f32.vlgmr.msra.gmra.mxu0 %vm777_vm2, %v1436_v44  ;;  %v1931_v52 = vpop.permute.xlu0 %1930 }
 0x35c   : > { %2540 = vmatmul.mubr.msk.f32.vlgmr.msra.gmra.mxu1 %vm854_vm3, %v865_v48  ;;  %2583 = vmatpush3.xpose.msk.msra.mxu0 %vm777_vm2, %v1603_v45 }
 0x35d   : > { %2543 = vmatpush3.xpose.msk.msra.mxu1 %vm777_vm2, %v942_v36  ;;  %2584 = vmatprep.mubr.msk.f32.mxu0 %vm3078_vm0, %v3077_v0 }
 0x35e   : > { %2544 = vmatprep.mubr.msk.f32.mxu1 %vm3078_vm0, %v3077_v0  ;;  %2592 = vmatprep.subr.mxu0 %v3077_v0 }
 0x35f   : > { %2585 = vmatmul.mubr.msk.f32.vlgmr.msra.gmra.mxu0 %vm777_vm2, %v1601_v47  ;;  %2547 = vmatprep.subr.mxu1 %v3077_v0 }
 0x360   : > { %2545 = vmatmul.mubr.msk.f32.vlgmr.msra.gmra.mxu1 %vm777_vm2, %v940_v37  ;;  %2593 = vmatpush3.xpose.msk.msra.mxu0 %vm777_vm2, %v1768_v49 }
 0x361   : > { %2594 = vmatprep.mubr.msk.f32.mxu0 %vm3078_vm0, %v3077_v0  ;;  %2602 = vmatprep.subr.mxu0 %v3077_v0 }
 0x362   : > { %2549 = vmatprep.mubr.msk.f32.mxu1 %vm3078_vm0, %v3077_v0 }
 0x363   : > { %2595 = vmatmul.mubr.msk.f32.vlgmr.msra.gmra.mxu0 %vm777_vm2, %v1766_v50 }
 0x364   : > { %2603 = vmatpush3.xpose.msk.msra.mxu0 %vm777_vm2, %v1933_v51  ;;  %2604 = vmatprep.mubr.msk.f32.mxu0 %vm3078_vm0, %v3077_v0 }
 0x365   : > { %2612 = vmatprep.subr.mxu0 %v3077_v0 }
 0x367   : > { %2605 = vmatmul.mubr.msk.f32.vlgmr.msra.gmra.mxu0 %vm777_vm2, %v1931_v52 }
 0x368   : > { %2620 = vmatprep.mubr.msk.f32.mxu0 %vm3078_vm0, %v3077_v0 }
 0x413   : > { %v1179_v53 = vpop.f32.mrf.mxu0 }
 0x414   : > { %v1183_v54 = vsel %vm854_vm3, %v1179_v53, -inf }
 0x415   : > { %1184 = vmax.xlane.f32.xlu0 %v1183_v54  ;;  %v2556_v55 = vpop.f32.mrf.mxu0 }
 0x417   : > { %v1344_v56 = vpop.f32.mrf.mxu0 }
 0x418   : > { %v1348_v57 = vsel %vm854_vm3, %v1344_v56, -inf }
 0x419   : > { %1349 = vmax.xlane.f32.xlu0 %v1348_v57  ;;  %v2566_v58 = vpop.f32.mrf.mxu0 }
 0x41b   : > { %v1509_v59 = vpop.f32.mrf.mxu0 }
 0x41c   : > { %v3473_v60 = vpop.f32.mrf.mxu1  ;;  %v1513_v8 = vsel %vm854_vm3, %v1509_v59, -inf }
 0x41d   : > { %v2576_v61 = vpop.f32.mrf.mxu0 }
 0x41e   : > { %v2541_v62 = vpop.f32.mrf.mxu1 }
 0x41f   : > { %v1674_v63 = vpop.f32.mrf.mxu0 }
 0x420   : > { %v3475_v1 = vpop.f32.mrf.mxu1  ;;  %v1678_v2 = vsel %vm854_vm3, %v1674_v63, -inf }
 0x421   : > { %1679 = vmax.xlane.f32.xlu0 %v1678_v2  ;;  %v2586_v3 = vpop.f32.mrf.mxu0  ;;  %v1017_v4 = vsel %vm854_vm3, %v3475_v1, -inf }
 0x422   : > { %1018 = vmax.xlane.f32.xlu1 %v1017_v4  ;;  %v2546_v5 = vpop.f32.mrf.mxu1 }
 0x423   : > { %v1839_v6 = vpop.f32.mrf.mxu0 }
 0x424   : > { %v1843_v12 = vsel %vm854_vm3, %v1839_v6, -inf }
 0x425   : > { %v2596_v7 = vpop.f32.mrf.mxu0 }
 0x426   : > { %1514 = vmax.xlane.f32.xlu1 %v1513_v8 }
 0x427   : > { %v2004_v9 = vpop.f32.mrf.mxu0 }
 0x428   : > { %v2008_v10 = vsel %vm854_vm3, %v2004_v9, -inf }
 0x429   : > { %2009 = vmax.xlane.f32.xlu0 %v2008_v10  ;;  %v2606_v11 = vpop.f32.mrf.mxu0 }
 0x42a   : > { %1844 = vmax.xlane.f32.xlu1 %v1843_v12 }
 0x49e   : > { %v1185_v13 = vpop.xlane.xlu0 %1184 }
 0x49f   : > { %v1186_v14 = vsub.f32 %v1179_v53, %v1185_v13 }
 0x4a1   : > { %v1187_v15 = vmul.f32 1.442695, %v1186_v14 }
 0x4a2   : > { %v1350_v16 = vpop.xlane.xlu0 %1349 }
 0x4a3   : > { %2758 = vpow2.f32 %v1187_v15  ;;  %v1351_v17 = vsub.f32 %v1344_v56, %v1350_v16 }
 0x4a5   : > { %v1352_v18 = vmul.f32 1.442695, %v1351_v17  ;;  %v2138_v17 = vld [vmem:[#allocation13 + $0x18] sm:$0xff] }
 0x4a6   : > { %2613 = vmatpush3.msra.mxu0 %v2138_v17 }
 0x4a7   : > { %2760 = vpow2.f32 %v1352_v18  ;;  %2614 = vmatprep.subr.mxu0 %v3077_v0 }
 0x4aa   : > { %v1680_v19 = vpop.xlane.xlu0 %1679 }
 0x4ab   : > { %v1681_v20 = vsub.f32 %v1674_v63, %v1680_v19  ;;  %v1019_v21 = vpop.xlane.xlu1 %1018 }
 0x4ac   : > { %v1020_v45 = vsub.f32 %v3475_v1, %v1019_v21  ;;  %v2136_v21 = vld [vmem:[#allocation13 + $0x8] sm:$0xff] }
 0x4ad   : > { %v1682_v22 = vmul.f32 1.442695, %v1681_v20  ;;  %v2137_v20 = vld [vmem:[#allocation13 + $0x10] sm:$0xff] }
 0x4ae   : > { %v1021_v46 = vmul.f32 1.442695, %v1020_v45  ;;  %2615 = vmatpush3.msra.mxu0 %v2137_v20 }
 0x4af   : > { %2762 = vpow2.f32 %v1682_v22  ;;  %v1515_v23 = vpop.xlane.xlu1 %1514  ;;  %2616 = vmatprep.subr.mxu0 %v3077_v0 }
 0x4b0   : > { %v3483_v24 = vpop.eup %2758  ;;  %v1516_v25 = vsub.f32 %v1509_v59, %v1515_v23  ;;  %2617 = vmatpush3.msra.mxu0 %v2136_v21 }
 0x4b1   : > { %v1189_v26 = vsel %vm854_vm3, %v3483_v24, 0.0  ;;  %2618 = vmatprep.subr.mxu0 %v3077_v0 }
 0x4b2   : > { %v1517_v27 = vmul.f32 1.442695, %v1516_v25  ;;  %1190 = vadd.xlane.f32.xlu0 %v1189_v26  ;;  %v2010_v28 = vpop.xlane.xlu0 %2009 }
 0x4b3   : > { %v2011_v29 = vsub.f32 %v2004_v9, %v2010_v28  ;;  %v1845_v30 = vpop.xlane.xlu1 %1844 }
 0x4b4   : > { %v3487_v31 = vpop.eup %2760  ;;  %2764 = vpow2.f32 %v1517_v27  ;;  %v1846_v32 = vsub.f32 %v1839_v6, %v1845_v30 }
 0x4b5   : > { %v2012_v33 = vmul.f32 1.442695, %v2011_v29  ;;  %v1354_v35 = vsel %vm854_vm3, %v3487_v31, 0.0 }
 0x4b6   : > { %v1847_v36 = vmul.f32 1.442695, %v1846_v32  ;;  %1355 = vadd.xlane.f32.xlu1 %v1354_v35 }
 0x4b7   : > { %2766 = vpow2.f32 %v2012_v33 }
 0x4b8   : > { %2768 = vpow2.f32 %v1847_v36 }
 0x4b9   : > { %2770 = vpow2.f32 %v1021_v46 }
 0x4bc   : > { %v3491_v37 = vpop.eup %2762 }
 0x4bd   : > { %v1684_v38 = vsel %vm854_vm3, %v3491_v37, 0.0 }
 0x4be   : > { %1685 = vadd.xlane.f32.xlu1 %v1684_v38 }
 0x4c1   : > { %v2765_v39 = vpop.eup %2764 }
 0x4c2   : > { %v1519_v40 = vsel %vm854_vm3, %v2765_v39, 0.0 }
 0x4c3   : > { %1520 = vadd.xlane.f32.xlu0 %v1519_v40 }
 0x4c4   : > { %v3496_v41 = vpop.eup %2766 }
 0x4c5   : > { %v3498_v42 = vpop.eup %2768  ;;  %v2014_v43 = vsel %vm854_vm3, %v3496_v41, 0.0 }
 0x4c6   : > { %2015 = vadd.xlane.f32.xlu1 %v2014_v43  ;;  %v1849_v44 = vsel %vm854_vm3, %v3498_v42, 0.0  ;;  %v2771_v47 = vpop.eup %2770 }
 0x4c7   : > { %1850 = vadd.xlane.f32.xlu0 %v1849_v44  ;;  %v1023_v48 = vsel %vm854_vm3, %v2771_v47, 0.0 }
 0x4d7   : > { %1194 = vrot.lane.b32.xlu1 %v3426_v34, %s3080_s17 }
 0x4dd   : > { %1029 = vrot.lane.b32.xlu0 %v3426_v34, %s3079_s13 }
 0x4e1   : > { %1524 = vrot.lane.b32.xlu0 %v3426_v34, %s3082_s29 }
 0x4e5   : > { %1854 = vrot.lane.b32.xlu0 %v3426_v34, %s3084_s12  ;;  %s2974_s12 = scalar_lea.vmem %s3564_s26, 128 }
 0x4e6   : > { %p2975_p11 = scmp.ne.s32.totalorder %s3564_s26, %s2974_s12 }
 0x4e8   : > { %p2976_p2 = pnand %p2975_p11, %p3676_p12 }
 0x4ea   : > { %p2977_p5 = pneg %p2976_p2 }
 0x4fb   : > { %1024 = vadd.xlane.f32.xlu1 %v1023_v48 }
 0x50c   : > { %1359 = vrot.lane.b32.xlu1 %v3426_v34, %s3081_s10  ;;  %s3675_s10 = sld [smem:[#allocation31_spill]] }
 0x510   : > { %1689 = vrot.lane.b32.xlu1 %v3426_v34, %s3083_s7  ;;  %s2214_s7 = scalar_lea.sflag [#allocation4], %s3340_s22 }
 0x512   : > { %s3562_s29 = scalar_lea.hbm %s3675_s10, %s2444_s30 }
 0x514   : > { %2019 = vrot.lane.b32.xlu1 %v3426_v34, %s3085_s18  ;;  %s2980_s18 = scalar_lea.vmem %s2979_s27, 256 }
 0x515   : > { %p2982_p1 = scmp.lt.s32.totalorder %s2980_s18, %s2974_s12 }
 0x517   : > { %p2983_p7 = por %p2982_p1, %p2981_p10 }
 0x519   : > { %p2984_p4 = pnand %p2983_p7, %p2977_p5 }
 0x53b   : > { %v1191_v49 = vpop.xlane.xlu0 %1190 }
 0x53f   : > { %v1356_v53 = vpop.xlane.xlu1 %1355 }
 0x547   : > { %v1686_v54 = vpop.xlane.xlu1 %1685 }
 0x54c   : > { %v1521_v50 = vpop.xlane.xlu0 %1520 }
 0x54f   : > { %v2016_v55 = vpop.xlane.xlu1 %2015 }
 0x550   : > { %v1851_v51 = vpop.xlane.xlu0 %1850 }
 0x553   : > { %v1195_v56 = vpop.permute.xlu1 %1194 }
 0x554   : > { %v1030_v52 = vpop.permute.xlu0 %1029 }
 0x555   : > { %2548 = vmatpush3.msra.mxu1 %v1030_v52 }
 0x556   : > { %2557 = vmatprep.subr.mxu1 %v3077_v0 }
 0x558   : > { %v1525_v3 = vpop.permute.xlu0 %1524 }
 0x55c   : > { %v1855_v9 = vpop.permute.xlu0 %1854 }
 0x584   : > { %v1025_v57 = vpop.xlane.xlu1 %1024 }
 0x585   : > { %2772 = vrcp.f32 %v1025_v57 }
 0x586   : > { %2774 = vrcp.f32 %v1191_v49 }
 0x587   : > { %2776 = vrcp.f32 %v1356_v53 }
 0x588   : > { %2778 = vrcp.f32 %v1521_v50  ;;  %v1360_v63 = vpop.permute.xlu1 %1359 }
 0x589   : > { %2780 = vrcp.f32 %v1686_v54 }
 0x58a   : > { %2782 = vrcp.f32 %v1851_v51 }
 0x58b   : > { %2784 = vrcp.f32 %v2016_v55 }
 0x58c   : > { %v1690_v6 = vpop.permute.xlu1 %1689 }
 0x590   : > { %v2020_v12 = vpop.permute.xlu1 %2019 }
 0x592   : > { %v2773_v58 = vpop.eup %2772 }
 0x593   : > { %v1027_v59 = vmul.f32 %v2773_v58, %v2771_v47  ;;  %v2775_v34 = vpop.eup %2774 }
 0x594   : > { %v1193_v61 = vmul.f32 %v2775_v34, %v3483_v24  ;;  %v2777_v62 = vpop.eup %2776  ;;  %v2135_v24 = vld [vmem:[#allocation13] sm:$0xff] }
 0x595   : > { %2550 = vmatmul.mubr.msk.f32.vlgmr.msra.gmra.mxu1 %vm854_vm3, %v1027_v59  ;;  %v1358_v1 = vmul.f32 %v2777_v62, %v3487_v31  ;;  %v2779_v2 = vpop.eup %2778  ;;  %2619 = vmatpush3.msra.mxu0 %v2135_v24 }
 0x596   : > { %2558 = vmatpush3.msra.mxu1 %v1195_v56  ;;  %2559 = vmatprep.mubr.msk.f32.mxu1 %vm3078_vm0, %v3077_v0  ;;  %v1523_v4 = vmul.f32 %v2779_v2, %v2765_v39  ;;  %v2781_v5 = vpop.eup %2780 }
 0x597   : > { %2567 = vmatprep.subr.mxu1 %v3077_v0  ;;  %v1688_v7 = vmul.f32 %v2781_v5, %v3491_v37  ;;  %v2783_v8 = vpop.eup %2782 }
 0x598   : > { %v1853_v10 = vmul.f32 %v2783_v8, %v3498_v42  ;;  %v2785_v11 = vpop.eup %2784 }
 0x599   : > { %2560 = vmatmul.mubr.msk.f32.vlgmr.msra.gmra.mxu1 %vm854_vm3, %v1193_v61  ;;  %v2018_v13 = vmul.f32 %v2785_v11, %v3496_v41 }
 0x59a   : > { %2568 = vmatpush3.msra.mxu1 %v1360_v63  ;;  %2569 = vmatprep.mubr.msk.f32.mxu1 %vm3078_vm0, %v3077_v0 }
 0x59b   : > { %2577 = vmatprep.subr.mxu1 %v3077_v0 }
 0x59d   : > { %2570 = vmatmul.mubr.msk.f32.vlgmr.msra.gmra.mxu1 %vm854_vm3, %v1358_v1 }
 0x59e   : > { %2578 = vmatpush3.msra.mxu1 %v1525_v3  ;;  %2579 = vmatprep.mubr.msk.f32.mxu1 %vm3078_vm0, %v3077_v0 }
 0x59f   : > { %2587 = vmatprep.subr.mxu1 %v3077_v0 }
 0x5a1   : > { %2580 = vmatmul.mubr.msk.f32.vlgmr.msra.gmra.mxu1 %vm854_vm3, %v1523_v4 }
 0x5a2   : > { %2588 = vmatpush3.msra.mxu1 %v1690_v6  ;;  %2589 = vmatprep.mubr.msk.f32.mxu1 %vm3078_vm0, %v3077_v0 }
 0x5a3   : > { %2597 = vmatprep.subr.mxu1 %v3077_v0 }
 0x5a5   : > { %2590 = vmatmul.mubr.msk.f32.vlgmr.msra.gmra.mxu1 %vm854_vm3, %v1688_v7 }
 0x5a6   : > { %2598 = vmatpush3.msra.mxu1 %v1855_v9  ;;  %2599 = vmatprep.mubr.msk.f32.mxu1 %vm3078_vm0, %v3077_v0 }
 0x5a7   : > { %2607 = vmatprep.subr.mxu1 %v3077_v0 }
 0x5a9   : > { %2600 = vmatmul.mubr.msk.f32.vlgmr.msra.gmra.mxu1 %vm854_vm3, %v1853_v10 }
 0x5aa   : > { %2608 = vmatpush3.msra.mxu1 %v2020_v12  ;;  %2609 = vmatprep.mubr.msk.f32.mxu1 %vm3078_vm0, %v3077_v0 }
 0x5ad   : > { %2610 = vmatmul.mubr.msk.f32.vlgmr.msra.gmra.mxu1 %vm854_vm3, %v2018_v13 }
 0x655   : > { %v1101_v14 = vpop.f32.mrf.mxu1 }
 0x656   : > { %2096 = vrot.lane.b32.xlu0 %v1101_v14, %s3086_s25 }
 0x657   : > { %v2551_v15 = vpop.f32.mrf.mxu1 }
 0x659   : > { %v1266_v16 = vpop.f32.mrf.mxu1 }
 0x65a   : > { %2100 = vrot.lane.b32.xlu1 %v1266_v16, %s3087_s3 }
 0x65b   : > { %v2561_v18 = vpop.f32.mrf.mxu1 }
 0x65d   : > { %v1431_v19 = vpop.f32.mrf.mxu1 }
 0x65e   : > { %2104 = vrot.lane.b32.xlu0 %v1431_v19, %s3088_s24 }
 0x65f   : > { %v2571_v22 = vpop.f32.mrf.mxu1 }
 0x661   : > { %v1596_v23 = vpop.f32.mrf.mxu1 }
 0x662   : > { %2108 = vrot.lane.b32.xlu1 %v1596_v23, %s3089_s5 }
 0x663   : > { %v2581_v25 = vpop.f32.mrf.mxu1 }
 0x665   : > { %v1761_v26 = vpop.f32.mrf.mxu1 }
 0x666   : > { %2112 = vrot.lane.b32.xlu0 %v1761_v26, %s3090_s20 }
 0x667   : > { %v2591_v27 = vpop.f32.mrf.mxu1 }
 0x669   : > { %v1926_v28 = vpop.f32.mrf.mxu1 }
 0x66a   : > { %2116 = vrot.lane.b32.xlu1 %v1926_v28, %s3091_s28 }
 0x66b   : > { %v2601_v29 = vpop.f32.mrf.mxu1 }
 0x66d   : > { %v2091_v30 = vpop.f32.mrf.mxu1 }
 0x66e   : > { %2120 = vrot.lane.b32.xlu0 %v2091_v30, %s3092_s21 }
 0x66f   : > { %v2611_v31 = vpop.f32.mrf.mxu1 }
 0x6c8   : > { %v2097_v32 = vpop.permute.xlu0 %2096 }
 0x6c9   : > { %v2123_v36 = vsel %vm777_vm2, %v3473_v60, %v2097_v32 }
 0x6cc   : > { %v2101_v33 = vpop.permute.xlu1 %2100 }
 0x6cd   : > { %v2124_v37 = vsel %vm854_vm3, %v2123_v36, %v2101_v33 }
 0x6d0   : > { %v2105_v0 = vpop.permute.xlu0 %2104 }
 0x6d1   : > { %v2126_v39 = vsel %vm2125_vm4, %v2124_v37, %v2105_v0 }
 0x6d4   : > { %v2109_v35 = vpop.permute.xlu1 %2108 }
 0x6d5   : > { %v2128_v41 = vsel %vm2127_vm5, %v2126_v39, %v2109_v35 }
 0x6d8   : > { %v2113_v38 = vpop.permute.xlu0 %2112 }
 0x6d9   : > { %v2130_v42 = vsel %vm2129_vm6, %v2128_v41, %v2113_v38 }
 0x6dc   : > { %v2117_v40 = vpop.permute.xlu1 %2116 }
 0x6dd   : > { %v2132_v43 = vsel %vm2131_vm7, %v2130_v42, %v2117_v40 }
 0x6e0   : > { %v2121_v44 = vpop.permute.xlu0 %2120 }
 0x6e1   : > { %v2134_v45 = vsel %vm2133_vm8, %v2132_v43, %v2121_v44 }
 0x6e2   : > { %2621 = vmatmul.mubr.msk.f32.vlgmr.msra.gmra.mxu0 %vm535_vm1, %v2134_v45 }
 0x7a2   : > { %v2208_v60 = vpop.f32.mrf.mxu0 }
 0x7a3   : > { %2212 = vst.msk [vmem:[%s520_s1] sm:$0xff] %vm535_vm1, %v2208_v60 }
 0x7a4   : > { %v2622_v46 = vpop.f32.mrf.mxu0 }
 0x7a5   : > { %2987 = shalt.err (!%p2984_p4)
}
 0x7a6   : > { %s2988_s23 = scalar_lea.hbm %s3562_s29, 128  ;;  %s2992_s25 = scalar_lea.hbm %s3675_s10, 256 }
 0x7a7   : > { %p2989_p8 = scmp.ne.s32.totalorder %s3562_s29, %s2988_s23  ;;  %p2993_p0 = scmp.lt.s32.totalorder %s3562_s29, %s3675_s10 }
 0x7a8   : > { %p2994_p13 = scmp.lt.s32.totalorder %s2992_s25, %s2988_s23 }
 0x7a9   : > { %p2990_p6 = pnand %p2989_p8, %p3676_p12 }
 0x7aa   : > { %p2995_p9 = por %p2994_p13, %p2993_p0 }
 0x7ab   : > { %p2991_p3 = pneg %p2990_p6 }
 0x7ad   : > { %p2996_p11 = pnand %p2995_p9, %p2991_p3 }
 0x7af   : > { %2999 = shalt.err (!%p2996_p11)
}
 0x7b0   : > { %2645 = dma.vmem_to_hbm [thread:$0]  (%p3676_p12), %s3564_s26, 128, %s3562_s29, %s2214_s7  }
 0x7b1 PF: > { %s3677_s5 = sld [smem:[#allocation20_spill]] }
 0x7b2   : > { %s3678_s20 = sld [smem:[#allocation26_spill]] }
 0x7b3   : > { %s3679_s28 = sld [smem:[#allocation22_spill]] }
 0x7b7   : > { %s2240_s21 = sand.u32 1, %s3677_s5  }
 0x7b8   : > { %p3680_p2 = scmp.ne.s32.totalorder %s3678_s20, 0  ;;  %s2241_s30 = scalar_lea.sflag [#allocation4], %s2240_s21 }
 0x7b9   : > { %p3681_p5 = scmp.ge.s32.totalorder %s3679_s28, 2 }
 0x7bb   : > { %p2671_p10 = pnand %p3681_p5, %p3680_p2 }
 0x7bd   : > { %p2672_p1 = pneg %p2671_p10 }
 0x7bf   : > { %3041 = dma.done.wait (%p2672_p1), %s2241_s30, 128  }
 0x7c0   : > { %3043 = vsyncadd (%p2672_p1), %s2241_s30, 4294967168  ;;  %s31_s18 = sadd.s32 1, %s3679_s28   ;;  %s3682_s19 = sld [smem:[#allocation25_spill]] }
 0x7c1   : > { %p28_p7 = scmp.ge.s32.totalorder %s31_s18, 4   ;;  %s3683_s16 = sld [smem:[#allocation21_spill]] }
 0x7c2   : > { %s3684_s17 = sld [smem:[#allocation23_spill]]  ;;  %s3685_s13 = smov %s3050_s14 }
 0x7c3   : > { %s3686_s14 = smov %s3054_s15  ;;  %30 = sbr.rel (!%p28_p7) target bundleno = 16 (0x10), region = 145 }
 0x7c6   : > { %s3687_s15 = smov %s3682_s19 }
 0x7c8   :  { %2246 = vsyncpa [#allocation3], 1 }
 0x7c9   :  { %2248 = vsyncpa [#allocation3 + $0x1], 1 }
 0x7ca   :  { %2249 = vsyncpa [#allocation6], 1 }
 0x7cb   :  { %2251 = vsyncpa [#allocation6 + $0x1], 1 }
 0x7cc   :  { %2252 = vsyncpa [#allocation9], 1 }
 0x7cd   :  { %2253 = vsyncpa [#allocation12], 1 }
 0x7ce   :  { %2254 = vsyncpa [#allocation4], 1 }
 0x7cf   :  { %2256 = vsyncpa [#allocation4 + $0x1], 1 }

</bundles_post_ra>
